<compile_context>
chip_gen: v7x
topology: tpu7x:2x2x1
jax: 0.10.0
libtpu: 0.0.40
codegen_flags: <defaults>
</compile_context>

<pallas_src>
import functools

import jax
import jax.numpy as jnp
from jax.experimental import pallas as pl
from jax.experimental.pallas import tpu as pltpu


def _ceil_to(v, m):
    return ((v + m - 1) // m) * m


# ---------------------------------------------------------------------------
# Fused multi-layer GNN kernel
# ---------------------------------------------------------------------------
def _gnn_fused_kernel(*refs, n_layers, Ks, Gps, relu_flags, batch_block,
                      compute_dtype):
    """One batch block through the whole layer stack.

    refs = (x_ref, s_ref, w2_0, b_0, ..., w2_{L-1}, b_{L-1}, o_ref, z_ref)
      x_ref : (Bt, Gp0, Np)      input features (features padded to 8,
                                  nodes padded to 128)
      s_ref : (Bt, Np, Np)       graph shift operator (compute dtype)
      w2_l  : (Fp_l, K_l*Gp_l)   fused, padded filter taps (compute dtype)
      b_l   : (Fp_l, 1)          bias (f32, zero in pad rows)
      o_ref : (Bt, Fp_L, Np)     output features (f32)
      z_ref : (max K*Gp, Np)     VMEM scratch holding the stacked taps
    """
    x_ref, s_ref = refs[0], refs[1]
    wb_refs = refs[2:2 + 2 * n_layers]
    o_ref = refs[2 + 2 * n_layers]
    z_ref = refs[3 + 2 * n_layers]

    for bi in range(batch_block):            # static unroll: interleaves the
        act = x_ref[bi]                      # independent per-batch diffusions
        for l in range(n_layers):            # (Gp, Np) f32 carry
            K, Gp = Ks[l], Gps[l]
            w_ref, b_ref = wb_refs[2 * l], wb_refs[2 * l + 1]

            # tap 0 at 8-aligned sublane offset 0
            z_ref[0:Gp, :] = act.astype(compute_dtype)
            xk = act
            for k in range(1, K):            # static unroll over taps
                # graph diffusion x_k = x_{k-1} @ S; f32 accumulation, S read
                # straight from the VMEM ref (already in compute dtype).
                xk = jnp.dot(xk.astype(compute_dtype), s_ref[bi],
                             preferred_element_type=jnp.float32)
                z_ref[k * Gp:(k + 1) * Gp, :] = xk.astype(compute_dtype)

            # Fused tap combination: one (Fp x K*Gp) @ (K*Gp x Np) MXU matmul.
            y = jnp.dot(w_ref[...], z_ref[0:K * Gp, :],
                        preferred_element_type=jnp.float32)     # (Fp, Np)
            y = y + b_ref[...]               # (Fp, 1) broadcast, f32 VPU
            if relu_flags[l]:
                y = jnp.maximum(y, 0.0)
            act = y

        o_ref[bi] = act.astype(o_ref.dtype)


def gnn_forward_pallas(x, S, params, *, batch_block=None,
                       mxu_dtype=jnp.bfloat16, s_buffers=None,
                       vmem_budget_bytes=48 * 2 ** 20, slice_output=True):
    """Fused L-layer GraphNeuralNetwork forward.

    x: (B, G0, N)  S: (B, N, N)  params: [(w (F,K,G), b (F,1)), ...]
    Returns (B, F_last, N) float32 (or the padded (B, Fp_last, Np) if
    slice_output=False, for consumers that want to fuse the slice).
    """
    B, G0, N = x.shape
    assert S.shape == (B, N, N)
    n_layers = len(params)
    assert n_layers >= 1

    # Lane-dense node axis (128) and sublane-aligned feature axis (8);
    # zero padding is exact (pad rows/cols never leak into valid positions).
    Np = _ceil_to(N, 128)
    Gp0 = _ceil_to(G0, 8)
    x_p = jnp.pad(x.astype(jnp.float32),
                  ((0, 0), (0, Gp0 - G0), (0, Np - N)))
    S_p = jnp.pad(S.astype(jnp.float32),
                  ((0, 0), (0, Np - N), (0, Np - N)))
    # S is only ever an MXU operand: cast once host-side (halves the dominant
    # HBM stream and the VMEM S block in the default bf16 path).
    S_p = S_p.astype(mxu_dtype)
    compute_itemsize = jnp.dtype(mxu_dtype).itemsize

    # Host-side fused/padded weight prep: (F,K,G) -> pad -> (Fp, K*Gp),
    # k-major / g-minor, matching the PyTorch h.reshape(F, E*K*G) contraction
    # order and the scratch layout (tap k occupies rows [k*Gp, (k+1)*Gp)).
    flat_wb = []
    Ks, Gps, relu_flags = [], [], []
    flops = 0
    bytes_acc = x_p.size * 4 + S_p.size * compute_itemsize
    fixed_vmem = 2 * 2 ** 20                  # compiler / internal headroom
    G, Gp = G0, Gp0
    max_kg = 8
    for i, (w, b) in enumerate(params):
        F, K, Gw = w.shape
        assert Gw == G, "layer feature sizes must chain"
        Fp = _ceil_to(F, 8)
        wp = jnp.pad(w.astype(jnp.float32),
                     ((0, Fp - F), (0, 0), (0, Gp - Gw)))       # (Fp, K, Gp)
        w2 = wp.reshape(Fp, K * Gp).astype(mxu_dtype)            # MXU dtype
        bp = jnp.pad(b.astype(jnp.float32).reshape(F, 1),
                     ((0, Fp - F), (0, 0)))                      # (Fp, 1) f32
        flat_wb += [w2, bp]
        Ks.append(K)
        Gps.append(Gp)
        relu_flags.append(i < n_layers - 1)    # ReLU on all layers but the last
        max_kg = max(max_kg, K * Gp)
        flops += 2 * B * ((K - 1) * Gp * Np * Np + Fp * K * Gp * Np)
        bytes_acc += w2.size * compute_itemsize + bp.size * 4
        fixed_vmem += 2 * (w2.size * compute_itemsize + Fp * 128 * 4)
        G, Gp = F, Fp
    F_last, Fp_last = G, Gp
    bytes_acc += B * Fp_last * Np * 4
    fixed_vmem += max_kg * Np * compute_itemsize       # z scratch (single buf)

    # Per-batch-element VMEM of the streamed blocks (S + x + out).
    per_elem_vmem = (Np * Np * compute_itemsize
                     + Gp0 * Np * 4
                     + Fp_last * Np * 4)

    # --- batch_block selection: divide B, keep the grid pipelined (>=3 steps,
    # >=2 for the v7x TC split), fit the VMEM budget, cap unroll at 8. ---
    if batch_block is None:
        min_steps = 3 if B >= 3 else (2 if B >= 2 else 1)
        batch_block = 1
        for bt in range(1, min(B, 8) + 1):
            if B % bt:
                continue
            if B // bt < min_steps:
                continue
            if fixed_vmem + 2 * bt * per_elem_vmem > vmem_budget_bytes:
                continue
            batch_block = bt
    assert B % batch_block == 0, "batch_block must divide the batch size"
    Bt = batch_block

    vmem_needed = fixed_vmem + 2 * Bt * per_elem_vmem
    # Explicit scoped-VMEM budget: >= 32 MiB (v5e default is only 16 MiB),
    # <= 64 MiB (v7x physical per TC).
    vmem_limit = int(min(64 * 2 ** 20, max(32 * 2 ** 20, 2 * vmem_needed)))

    kern = functools.partial(
        _gnn_fused_kernel,
        n_layers=n_layers, Ks=tuple(Ks), Gps=tuple(Gps),
        relu_flags=tuple(relu_flags), batch_block=Bt, compute_dtype=mxu_dtype)

    # Optional deeper buffering of the S stream (v6e has the VMEM headroom).
    s_spec_kwargs = {}
    if s_buffers is not None and s_buffers != 2:
        s_spec_kwargs["pipeline_mode"] = pl.Buffered(s_buffers)

    in_specs = [
        pl.BlockSpec((Bt, Gp0, Np), lambda bi: (bi, 0, 0)),              # x
        pl.BlockSpec((Bt, Np, Np), lambda bi: (bi, 0, 0), **s_spec_kwargs),  # S
    ]
    for l in range(n_layers):
        w2, bp = flat_wb[2 * l], flat_wb[2 * l + 1]
        in_specs.append(pl.BlockSpec(w2.shape, lambda bi: (0, 0)))  # weights
        in_specs.append(pl.BlockSpec(bp.shape, lambda bi: (0, 0)))  # bias

    out = pl.pallas_call(
        kern,
        out_shape=jax.ShapeDtypeStruct((B, Fp_last, Np), jnp.float32),
        grid=(B // Bt,),
        in_specs=in_specs,
        out_specs=pl.BlockSpec((Bt, Fp_last, Np), lambda bi: (bi, 0, 0)),
        scratch_shapes=[pltpu.VMEM((max_kg, Np), mxu_dtype)],
        compiler_params=pltpu.CompilerParams(
            dimension_semantics=("parallel",),
            vmem_limit_bytes=vmem_limit),
        cost_estimate=pl.CostEstimate(
            flops=flops, transcendentals=0, bytes_accessed=bytes_acc),
    )(x_p, S_p, *flat_wb)

    if slice_output:
        out = out[:, :F_last, :N]
    return out


# ---------------------------------------------------------------------------
# Parameter init matching GraphFilter.__init__ (normal(0.3, 0.1), zero bias)
# ---------------------------------------------------------------------------
def init_gnn_params(key, ks, fs):
    params = []
    for i, k in enumerate(ks):
        f_in, f_out = fs[i], fs[i + 1]
        key, sub = jax.random.split(key)
        w = 0.3 + 0.1 * jax.random.normal(sub, (f_out, k, f_in),
                                          dtype=jnp.float32)
        b = jnp.zeros((f_out, 1), dtype=jnp.float32)
        params.append((w, b))
    return params


# ----- pure-JAX reference mirroring the PyTorch forward (for validation) -----
def _graph_filter_ref(x, S, w, b, relu):
    F, K, G = w.shape
    zs = [x]
    xk = x
    for _ in range(1, K):
        xk = jnp.einsum("bgn,bnm->bgm", xk, S)
        zs.append(xk)
    z = jnp.stack(zs, axis=1)                        # (B, K, G, N)
    y = jnp.einsum("bkgn,fkg->bfn", z, w) + b[None]  # (B, F, N)
    return jnp.maximum(y, 0.0) if relu else y


def gnn_forward_ref(x, S, params):
    n_layers = len(params)
    for i, (w, b) in enumerate(params):
        x = _graph_filter_ref(x, S, w, b, relu=(i < n_layers - 1))
    return x


if __name__ == "__main__":
    # Small deterministic setup: 2-layer GNN, ks=(3, 3), fs=(2, 4, 3),
    # batch B=6 (so the grid has >=3 steps), N=16 graph nodes (padded to 128
    # lanes inside the wrapper; features padded to 8 sublanes).
    ks = (3, 3)
    fs = (2, 4, 3)
    B, N = 6, 16
    G = fs[0]

    key = jax.random.PRNGKey(0)
    kx, kS, kp = jax.random.split(key, 3)
    x = jax.random.normal(kx, (B, G, N), dtype=jnp.float32)
    # symmetric-ish normalized shift operator
    A = jax.random.normal(kS, (B, N, N), dtype=jnp.float32)
    S = (A + jnp.swapaxes(A, -1, -2)) / (2.0 * jnp.sqrt(N))

    params = init_gnn_params(kp, ks, fs)
    y_ref = gnn_forward_ref(x, S, params)

    # f32 MXU operands: bit-accurate path (one element per grid step).
    y_f32 = gnn_forward_pallas(x, S, params, batch_block=1,
                               mxu_dtype=jnp.float32)
    y_f32 = jax.block_until_ready(y_f32)
    assert y_f32.shape == (B, fs[-1], N), y_f32.shape
    assert jnp.allclose(y_f32, y_ref, atol=1e-4, rtol=1e-4), \
        "f32 mismatch vs reference"

    # Multi-element batch block (2 elems / step -> 3 grid steps), f32.
    y_bt = gnn_forward_pallas(x, S, params, batch_block=2,
                              mxu_dtype=jnp.float32)
    y_bt = jax.block_until_ready(y_bt)
    assert jnp.allclose(y_bt, y_ref, atol=1e-4, rtol=1e-4), \
        "batched-block mismatch"

    # Default fast path: bf16 S / MXU operands, auto batch_block selection.
    # (bf16 re-quantizes the carry per tap -> documented looser tolerance.)
    y_bf16 = gnn_forward_pallas(x, S, params)
    y_bf16 = jax.block_until_ready(y_bf16)
    assert y_bf16.shape == (B, fs[-1], N), y_bf16.shape
    assert jnp.allclose(y_bf16, y_ref, atol=1e-1, rtol=1e-1), \
        "bf16 path mismatch"

    print("KERNEL_OK")
</pallas_src>

<mosaic_0001>
module attributes {stable_mosaic.version = 11 : i64} {
  func.func @_gnn_fused_kernel(%arg0: i32, %arg1: memref<1x8x128xf32, #tpu.memory_space<vmem>>, %arg2: memref<1x128x128xf32, #tpu.memory_space<vmem>>, %arg3: memref<8x24xf32, #tpu.memory_space<vmem>>, %arg4: memref<8x1xf32, #tpu.memory_space<vmem>>, %arg5: memref<8x24xf32, #tpu.memory_space<vmem>>, %arg6: memref<8x1xf32, #tpu.memory_space<vmem>>, %arg7: memref<1x8x128xf32, #tpu.memory_space<vmem>>, %arg8: memref<24x128xf32, #tpu.memory_space<vmem>>) attributes {dimension_semantics = [#tpu.dimension_semantics<parallel>], iteration_bounds = array<i64: 6>, scalar_prefetch = 0 : i64, scratch_operands = 1 : i64, tpu.core_type = #tpu.core_type<tc>, window_params = [{transform_indices = @transform_0, window_bounds = array<i64: 1, 8, 128>}, {transform_indices = @transform_1, window_bounds = array<i64: 1, 128, 128>}, {pipeline_mode = #tpu.pipeline_mode<synchronous>, transform_indices = @transform_2, window_bounds = array<i64: 8, 24>}, {pipeline_mode = #tpu.pipeline_mode<synchronous>, transform_indices = @transform_3, window_bounds = array<i64: 8, 1>}, {pipeline_mode = #tpu.pipeline_mode<synchronous>, transform_indices = @transform_4, window_bounds = array<i64: 8, 24>}, {pipeline_mode = #tpu.pipeline_mode<synchronous>, transform_indices = @transform_5, window_bounds = array<i64: 8, 1>}, {transform_indices = @transform_6, window_bounds = array<i64: 1, 8, 128>}]} {
    %c0 = arith.constant 0 : index
    %c0_0 = arith.constant 0 : index
    %c0_1 = arith.constant 0 : index
    %0 = vector.load %arg1[%c0, %c0_0, %c0_1] : memref<1x8x128xf32, #tpu.memory_space<vmem>>, vector<1x8x128xf32>
    %1 = vector.shape_cast %0 : vector<1x8x128xf32> to vector<8x128xf32>
    %c0_2 = arith.constant 0 : index
    %c0_3 = arith.constant 0 : index
    %2 = vector.load %arg8[%c0_2, %c0_3] : memref<24x128xf32, #tpu.memory_space<vmem>>, vector<8x128xf32>
    tpu.vector_store %arg8[%c0_2, %c0_3], %1 {strides = array<i32>} : memref<24x128xf32, #tpu.memory_space<vmem>>, vector<8x128xf32>,
    %c0_4 = arith.constant 0 : index
    %c0_5 = arith.constant 0 : index
    %c0_6 = arith.constant 0 : index
    %3 = vector.load %arg2[%c0_4, %c0_5, %c0_6] : memref<1x128x128xf32, #tpu.memory_space<vmem>>, vector<1x128x128xf32>
    %4 = vector.shape_cast %3 : vector<1x128x128xf32> to vector<128x128xf32>
    %cst = arith.constant dense<0.000000e+00> : vector<8x128xf32>
    %5 = tpu.matmul %1, %4, %cst {dimension_numbers = #tpu.dot_dimension_numbers<[1], [0], [0], [1], [0, 0, 1, 1], [], []>} : vector<8x128xf32>, vector<128x128xf32>, vector<8x128xf32> -> vector<8x128xf32>
    %c8 = arith.constant 8 : index
    %c0_7 = arith.constant 0 : index
    %6 = vector.load %arg8[%c8, %c0_7] : memref<24x128xf32, #tpu.memory_space<vmem>>, vector<8x128xf32>
    tpu.vector_store %arg8[%c8, %c0_7], %5 {strides = array<i32>} : memref<24x128xf32, #tpu.memory_space<vmem>>, vector<8x128xf32>,
    %c0_8 = arith.constant 0 : index
    %c0_9 = arith.constant 0 : index
    %c0_10 = arith.constant 0 : index
    %7 = vector.load %arg2[%c0_8, %c0_9, %c0_10] : memref<1x128x128xf32, #tpu.memory_space<vmem>>, vector<1x128x128xf32>
    %8 = vector.shape_cast %7 : vector<1x128x128xf32> to vector<128x128xf32>
    %cst_11 = arith.constant dense<0.000000e+00> : vector<8x128xf32>
    %9 = tpu.matmul %5, %8, %cst_11 {dimension_numbers = #tpu.dot_dimension_numbers<[1], [0], [0], [1], [0, 0, 1, 1], [], []>} : vector<8x128xf32>, vector<128x128xf32>, vector<8x128xf32> -> vector<8x128xf32>
    %c16 = arith.constant 16 : index
    %c0_12 = arith.constant 0 : index
    %10 = vector.load %arg8[%c16, %c0_12] : memref<24x128xf32, #tpu.memory_space<vmem>>, vector<8x128xf32>
    tpu.vector_store %arg8[%c16, %c0_12], %9 {strides = array<i32>} : memref<24x128xf32, #tpu.memory_space<vmem>>, vector<8x128xf32>,
    %c0_13 = arith.constant 0 : index
    %c0_14 = arith.constant 0 : index
    %11 = vector.load %arg3[%c0_13, %c0_14] : memref<8x24xf32, #tpu.memory_space<vmem>>, vector<8x24xf32>
    %c0_15 = arith.constant 0 : index
    %c0_16 = arith.constant 0 : index
    %12 = vector.load %arg8[%c0_15, %c0_16] : memref<24x128xf32, #tpu.memory_space<vmem>>, vector<24x128xf32>
    %cst_17 = arith.constant dense<0.000000e+00> : vector<8x128xf32>
    %13 = tpu.matmul %11, %12, %cst_17 {dimension_numbers = #tpu.dot_dimension_numbers<[1], [0], [0], [1], [0, 0, 1, 1], [], []>} : vector<8x24xf32>, vector<24x128xf32>, vector<8x128xf32> -> vector<8x128xf32>
    %c0_18 = arith.constant 0 : index
    %c0_19 = arith.constant 0 : index
    %14 = vector.load %arg4[%c0_18, %c0_19] : memref<8x1xf32, #tpu.memory_space<vmem>>, vector<8x1xf32>
    %15 = vector.broadcast %14 : vector<8x1xf32> to vector<8x128xf32>
    %16 = arith.addf %13, %15 : vector<8x128xf32>
    %cst_20 = arith.constant 0.000000e+00 : f32
    %17 = vector.broadcast %cst_20 : f32 to vector<8x128xf32>
    %18 = arith.maximumf %16, %17 : vector<8x128xf32>
    %c0_21 = arith.constant 0 : index
    %c0_22 = arith.constant 0 : index
    %19 = vector.load %arg8[%c0_21, %c0_22] : memref<24x128xf32, #tpu.memory_space<vmem>>, vector<8x128xf32>
    tpu.vector_store %arg8[%c0_21, %c0_22], %18 {strides = array<i32>} : memref<24x128xf32, #tpu.memory_space<vmem>>, vector<8x128xf32>,
    %c0_23 = arith.constant 0 : index
    %c0_24 = arith.constant 0 : index
    %c0_25 = arith.constant 0 : index
    %20 = vector.load %arg2[%c0_23, %c0_24, %c0_25] : memref<1x128x128xf32, #tpu.memory_space<vmem>>, vector<1x128x128xf32>
    %21 = vector.shape_cast %20 : vector<1x128x128xf32> to vector<128x128xf32>
    %cst_26 = arith.constant dense<0.000000e+00> : vector<8x128xf32>
    %22 = tpu.matmul %18, %21, %cst_26 {dimension_numbers = #tpu.dot_dimension_numbers<[1], [0], [0], [1], [0, 0, 1, 1], [], []>} : vector<8x128xf32>, vector<128x128xf32>, vector<8x128xf32> -> vector<8x128xf32>
    %c8_27 = arith.constant 8 : index
    %c0_28 = arith.constant 0 : index
    %23 = vector.load %arg8[%c8_27, %c0_28] : memref<24x128xf32, #tpu.memory_space<vmem>>, vector<8x128xf32>
    tpu.vector_store %arg8[%c8_27, %c0_28], %22 {strides = array<i32>} : memref<24x128xf32, #tpu.memory_space<vmem>>, vector<8x128xf32>,
    %c0_29 = arith.constant 0 : index
    %c0_30 = arith.constant 0 : index
    %c0_31 = arith.constant 0 : index
    %24 = vector.load %arg2[%c0_29, %c0_30, %c0_31] : memref<1x128x128xf32, #tpu.memory_space<vmem>>, vector<1x128x128xf32>
    %25 = vector.shape_cast %24 : vector<1x128x128xf32> to vector<128x128xf32>
    %cst_32 = arith.constant dense<0.000000e+00> : vector<8x128xf32>
    %26 = tpu.matmul %22, %25, %cst_32 {dimension_numbers = #tpu.dot_dimension_numbers<[1], [0], [0], [1], [0, 0, 1, 1], [], []>} : vector<8x128xf32>, vector<128x128xf32>, vector<8x128xf32> -> vector<8x128xf32>
    %c16_33 = arith.constant 16 : index
    %c0_34 = arith.constant 0 : index
    %27 = vector.load %arg8[%c16_33, %c0_34] : memref<24x128xf32, #tpu.memory_space<vmem>>, vector<8x128xf32>
    tpu.vector_store %arg8[%c16_33, %c0_34], %26 {strides = array<i32>} : memref<24x128xf32, #tpu.memory_space<vmem>>, vector<8x128xf32>,
    %c0_35 = arith.constant 0 : index
    %c0_36 = arith.constant 0 : index
    %28 = vector.load %arg5[%c0_35, %c0_36] : memref<8x24xf32, #tpu.memory_space<vmem>>, vector<8x24xf32>
    %c0_37 = arith.constant 0 : index
    %c0_38 = arith.constant 0 : index
    %29 = vector.load %arg8[%c0_37, %c0_38] : memref<24x128xf32, #tpu.memory_space<vmem>>, vector<24x128xf32>
    %cst_39 = arith.constant dense<0.000000e+00> : vector<8x128xf32>
    %30 = tpu.matmul %28, %29, %cst_39 {dimension_numbers = #tpu.dot_dimension_numbers<[1], [0], [0], [1], [0, 0, 1, 1], [], []>} : vector<8x24xf32>, vector<24x128xf32>, vector<8x128xf32> -> vector<8x128xf32>
    %c0_40 = arith.constant 0 : index
    %c0_41 = arith.constant 0 : index
    %31 = vector.load %arg6[%c0_40, %c0_41] : memref<8x1xf32, #tpu.memory_space<vmem>>, vector<8x1xf32>
    %32 = vector.broadcast %31 : vector<8x1xf32> to vector<8x128xf32>
    %33 = arith.addf %30, %32 : vector<8x128xf32>
    %c0_42 = arith.constant 0 : index
    %c0_43 = arith.constant 0 : index
    %c0_44 = arith.constant 0 : index
    %34 = vector.load %arg7[%c0_42, %c0_43, %c0_44] : memref<1x8x128xf32, #tpu.memory_space<vmem>>, vector<1x8x128xf32>
    %35 = vector.shape_cast %34 : vector<1x8x128xf32> to vector<8x128xf32>
    %36 = vector.shape_cast %33 : vector<8x128xf32> to vector<1x8x128xf32>
    tpu.vector_store %arg7[%c0_42, %c0_43, %c0_44], %36 {strides = array<i32>} : memref<1x8x128xf32, #tpu.memory_space<vmem>>, vector<1x8x128xf32>,
    return
  }
  func.func @transform_0(%arg0: i32) -> (i32, i32, i32) {
    %c0_i32 = arith.constant 0 : i32
    %c0_i32_0 = arith.constant 0 : i32
    %c0_i32_1 = arith.constant 0 : i32
    return %arg0, %c0_i32, %c0_i32_0 : i32, i32, i32
  }
  func.func @transform_1(%arg0: i32) -> (i32, i32, i32) {
    %c0_i32 = arith.constant 0 : i32
    %c0_i32_0 = arith.constant 0 : i32
    %c0_i32_1 = arith.constant 0 : i32
    return %arg0, %c0_i32, %c0_i32_0 : i32, i32, i32
  }
  func.func @transform_2(%arg0: i32) -> (i32, i32) {
    %c0_i32 = arith.constant 0 : i32
    %c0_i32_0 = arith.constant 0 : i32
    %c0_i32_1 = arith.constant 0 : i32
    return %c0_i32, %c0_i32_0 : i32, i32
  }
  func.func @transform_3(%arg0: i32) -> (i32, i32) {
    %c0_i32 = arith.constant 0 : i32
    %c0_i32_0 = arith.constant 0 : i32
    %c0_i32_1 = arith.constant 0 : i32
    return %c0_i32, %c0_i32_0 : i32, i32
  }
  func.func @transform_4(%arg0: i32) -> (i32, i32) {
    %c0_i32 = arith.constant 0 : i32
    %c0_i32_0 = arith.constant 0 : i32
    %c0_i32_1 = arith.constant 0 : i32
    return %c0_i32, %c0_i32_0 : i32, i32
  }
  func.func @transform_5(%arg0: i32) -> (i32, i32) {
    %c0_i32 = arith.constant 0 : i32
    %c0_i32_0 = arith.constant 0 : i32
    %c0_i32_1 = arith.constant 0 : i32
    return %c0_i32, %c0_i32_0 : i32, i32
  }
  func.func @transform_6(%arg0: i32) -> (i32, i32, i32) {
    %c0_i32 = arith.constant 0 : i32
    %c0_i32_0 = arith.constant 0 : i32
    %c0_i32_1 = arith.constant 0 : i32
    return %arg0, %c0_i32, %c0_i32_0 : i32, i32, i32
  }
}

</mosaic_0001>

<bundles_post_ra>
// kernel: tpu_custom_call.1
= control target key start
LH: loop header
LB: loop body
LE: loop exit
PB: predicated region body
PF: predicated region fallthrough
CT: control target
= control target key end

     0   :  { %11 = vsyncpa [#allocation4], 0  ;;  %s1862_s0 = inlined_call_operand.hbm [shape: f32[6,8,128], index: 0, kind: input, shape index: {}]   ;;  %s1863_s1 = inlined_call_operand.hbm [shape: f32[6,128,128], index: 1, kind: input, shape index: {}]   ;;  %s1864_s2 = inlined_call_operand.vmem [shape: f32[8,24], index: 2, kind: input, shape index: {}]   ;;  %s1865_s3 = inlined_call_operand.vmem [shape: f32[8,1], index: 3, kind: input, shape index: {}]   ;;  %s1866_s4 = inlined_call_operand.vmem [shape: f32[8,24], index: 4, kind: input, shape index: {}]   ;;  %s1867_s5 = inlined_call_operand.vmem [shape: f32[8,1], index: 5, kind: input, shape index: {}]   ;;  %s1868_s6 = inlined_call_operand.hbm [shape: f32[6,8,128], index: 6, kind: output, shape index: {}]  }
   0x1   :  { %13 = vsyncpa [#allocation4 + $0x1], 0 }
   0x2   :  { %14 = vsyncpa [#allocation7], 0 }
   0x3   :  { %16 = vsyncpa [#allocation7 + $0x1], 0 }
   0x4   :  { %17 = vsyncpa [#allocation5], 0 }
   0x5   :  { %19 = vsyncpa [#allocation5 + $0x1], 0  ;;  %s1523_s21 = smov 0   ;;  %s1525_s22 = smov 0  }
   0x6   :  { %s1527_s23 = smov 0   ;;  %s1529_s24 = smov 0  }
   0x7 LB: > { %s1544_s25 = sadd.s32 4294967295, %s1477_s24   ;;  %s934_s26 = sadd.s32 4294967294, %s1477_s24   ;;  %s1477_s24 = sphi %s1529_s24, %s1885_s24   ;;  %s1473_s23 = sphi %s1527_s23, %s1884_s23   ;;  %s1469_s22 = sphi %s1525_s22, %s1883_s22   ;;  %s1465_s21 = sphi %s1523_s21, %s1882_s21  }
   0x8   : > { %s1548_s27 = sadd.s32 1, %s1477_s24   ;;  %s32_s28 = sadd.s32 1, %s1473_s23 }
   0x9   : > { %s29_s29 = ssub.s32 %s1477_s24, %s1548_s27  ;;  %p39_p0 = scmp.ne.s32.totalorder %s1473_s23, %s1469_s22 }
   0xa   : > { %p30_p1 = scmp.eq.s32.totalorder %s29_s29, 0  ;;  %p40_p2 = scmp.eq.s32.totalorder %s1477_s24, 0 }
   0xb   : > { %p45_p3 = scmp.ne.s32.totalorder %s1469_s22, %s1465_s21  ;;  %p46_p4 = scmp.eq.s32.totalorder %s1544_s25, 0 }
   0xc   : > { %s1560_s30 = scalar_select %p30_p1, %s1473_s23, %s32_s28  }
   0xd   : > { %p1562_p5 = por %p40_p2, %p39_p0  ;;  %p1566_p6 = por %p46_p4, %p45_p3 }
   0xe   : > { %p179_p7 = scmp.eq.s32.totalorder %s1544_s25, 5  ;;  %p185_p8 = scmp.eq.s32.totalorder %s934_s26, 5 }
   0xf   : > { %s1872_s8 = scalar_select %p1566_p6, 1, 0 }
  0x10   : > { %p1306_p9 = scmp.lt.s32.totalorder %s1477_s24, 6  ;;  %p1572_p10 = por %p179_p7, %p39_p0 }
  0x11   : > { %p1576_p11 = por %p185_p8, %p45_p3  ;;  %s1581_s11 = sand.u32 1, %s1473_s23  }
  0x12   : > { %s1873_s9 = scalar_select %p1572_p10, 1, 0 }
  0x13   : > { %s1874_s10 = scalar_select %p1576_p11, 1, 0 }
  0x14   : > { %s938_s12 = sshll.u32 %s1477_s24, 7  ;;  %s937_s13 = sshll.u32 %s1581_s11, 3 }
  0x15   : > { %s1588_s16 = scalar_lea.hbm %s1862_s0, %s938_s12  ;;  %s221_s17 = scalar_lea.vmem [#allocation3], %s937_s13 }
  0x16   : > { %s228_s18 = sshll.u32 %s221_s17, 4  ;;  %p1592_p12 = pnand %p1306_p9, %p1562_p5  ;;  %s1596_s18 = int_to_ptr.vmem [resolvable:$true] %s228_s18 }
  0x17   : > { %s218_s20 = scalar_lea.sflag [#allocation4], %s1581_s11  ;;  %s1347_s26 = scalar_lea.hbm %s1588_s16, 128 }
  0x18   : > { %p1348_p1 = scmp.ne.s32.totalorder %s1588_s16, %s1347_s26  ;;  %p1349_p2 = pneg %p1592_p12 }
  0x19   : > { %s1352_s7 = scalar_lea.hbm %s1862_s0, 768  ;;  %p1353_p5 = scmp.lt.u32.totalorder %s1588_s16, %s1862_s0 }
  0x1a   : > { %p1350_p3 = pnand %p1349_p2, %p1348_p1  ;;  %p1354_p7 = scmp.lt.u32.totalorder %s1352_s7, %s1347_s26 }
  0x1b   : > { %p1356_p9 = scmp.lt.u32.totalorder %s1347_s26, %s1588_s16 }
  0x1c   : > { %p1351_p4 = pneg %p1350_p3  ;;  %p1355_p8 = por %p1354_p7, %p1353_p5 }
  0x1e   : > { %p1357_p13 = por %p1356_p9, %p1355_p8 }
  0x20   : > { %p1358_p0 = pnand %p1357_p13, %p1351_p4 }
  0x22   : > { %1361 = shalt.err (!%p1358_p0)
}
  0x23   : > { %s1362_s14 = scalar_lea.vmem %s1596_s18, 128  ;;  %s1479_s15 = smov [#allocation3]  }
  0x24   : > { %p1363_p1 = scmp.ne.s32.totalorder %s1596_s18, %s1362_s14  ;;  %s1367_s17 = sshll.u32 %s1479_s15, 4  ;;  %s1368_s17 = int_to_ptr.vmem [resolvable:$false] %s1367_s17 }
  0x25   : > { %s1369_s28 = scalar_lea.vmem %s1368_s17, 256  ;;  %p1370_p10 = scmp.lt.s32.totalorder %s1596_s18, %s1368_s17 }
  0x26   : > { %p1365_p3 = pnand %p1363_p1, %p1349_p2  ;;  %p1371_p5 = scmp.lt.s32.totalorder %s1369_s28, %s1362_s14 }
  0x28   : > { %p1366_p11 = pneg %p1365_p3  ;;  %p1372_p7 = por %p1371_p5, %p1370_p10 }
  0x2a   : > { %p1373_p8 = pnand %p1372_p7, %p1366_p11 }
  0x2c   : > { %1376 = shalt.err (!%p1373_p8)
}
  0x2d   : > { %1298 = dma.hbm_to_vmem [thread:$0]  (!%p1592_p12), %s1588_s16, 128, %s1596_s18, %s218_s20  }
  0x2e   : > { %p1876_p13 = scmp.lt.s32.totalorder %s1477_s24, 7  ;;  %p1877_p0 = scmp.ge.s32.totalorder %s1477_s24, 1 }
  0x2f   : > { %s939_s29 = sshll.u32 %s1581_s11, 7  ;;  %s952_s7 = sshll.u32 %s1477_s24, 11 }
  0x30   : > { %p1630_p4 = pnand %p1877_p0, %p1876_p13  ;;  %s1639_s14 = scalar_lea.hbm %s1863_s1, %s952_s7 }
  0x31   : > { %s239_s15 = scalar_lea.vmem [#allocation6], %s939_s29  ;;  %s236_s16 = scalar_lea.sflag [#allocation7], %s1581_s11 }
  0x32   : > { %s246_s17 = sshll.u32 %s239_s15, 4  ;;  %s1377_s18 = scalar_lea.hbm %s1639_s14, 2048  ;;  %s1641_s17 = int_to_ptr.vmem [resolvable:$true] %s246_s17 }
  0x33   : > { %p1378_p10 = scmp.ne.s32.totalorder %s1639_s14, %s1377_s18  ;;  %s1382_s7 = scalar_lea.hbm %s1863_s1, 12288 }
  0x34   : > { %p1383_p1 = scmp.lt.u32.totalorder %s1639_s14, %s1863_s1  ;;  %p1384_p3 = scmp.lt.u32.totalorder %s1382_s7, %s1377_s18 }
  0x35   : > { %p1380_p11 = pnand %p1378_p10, %p1349_p2  ;;  %p1386_p7 = scmp.lt.u32.totalorder %s1377_s18, %s1639_s14 }
  0x36   : > { %p1385_p5 = por %p1384_p3, %p1383_p1 }
  0x37   : > { %p1381_p9 = pneg %p1380_p11 }
  0x38   : > { %p1387_p8 = por %p1386_p7, %p1385_p5 }
  0x3a   : > { %p1388_p13 = pnand %p1387_p8, %p1381_p9 }
  0x3c   : > { %1391 = shalt.err (!%p1388_p13)
}
  0x3d   : > { %s1392_s29 = scalar_lea.vmem %s1641_s17, 2048  ;;  %s1480_s15 = smov [#allocation6]  }
  0x3e   : > { %p1393_p0 = scmp.ne.s32.totalorder %s1641_s17, %s1392_s29  ;;  %s1397_s20 = sshll.u32 %s1480_s15, 4  ;;  %s1398_s20 = int_to_ptr.vmem [resolvable:$false] %s1397_s20 }
  0x3f   : > { %s1399_s28 = scalar_lea.vmem %s1398_s20, 4096  ;;  %p1400_p6 = scmp.lt.s32.totalorder %s1641_s17, %s1398_s20 }
  0x40   : > { %p1395_p10 = pnand %p1393_p0, %p1349_p2  ;;  %p1401_p1 = scmp.lt.s32.totalorder %s1399_s28, %s1392_s29 }
  0x42   : > { %p1396_p11 = pneg %p1395_p10  ;;  %p1402_p3 = por %p1401_p1, %p1400_p6 }
  0x44   : > { %p1403_p5 = pnand %p1402_p3, %p1396_p11 }
  0x46   : > { %1406 = shalt.err (!%p1403_p5)
}
  0x47   : > { %s1481_s18 = smov 128   ;;  %s1482_s7 = smov 8  }
  0x48   : > { %1301 = dma.hbm_to_vmem [thread:$0]  (!%p1592_p12), %s1639_s14, 2048, %s1641_s17, %s236_s16, %s1481_s18, %s1481_s18, %s1482_s7  }
  0x49   : > { %258 = sbr.rel (%p1630_p4) target bundleno = 1412 (0x584), region = 44  ;;  %s1672_s12 = sand.u32 (!%p1630_p4), 1, %s1469_s22  }
  0x4a   : > { %s943_s13 = sshll.u32 (!%p1630_p4), %s1672_s12, 3  ;;  %s261_s29 = scalar_lea.sflag (!%p1630_p4), [#allocation4], %s1672_s12 }
  0x4b   : > { %s1678_s15 = scalar_lea.vmem (!%p1630_p4), [#allocation3], %s943_s13  ;;  %p1879_p6 = scmp.ne.s32.totalorder (!%p1630_p4), %s1872_s8, 0 }
  0x50   : > { %1452 = dma.done.wait (%p1879_p6), %s261_s29, 128  }
  0x51   : > { %1454 = vsyncadd (%p1879_p6), %s261_s29, 4294967168  ;;  %s944_s11 = sshll.u32 %s1672_s12, 7  ;;  %s270_s19 = scalar_lea.sflag [#allocation7], %s1672_s12 }
  0x52   : > { %s1686_s26 = scalar_lea.vmem [#allocation6], %s944_s11 }
  0x53   : > { %1456 = dma.done.wait (%p1879_p6), %s270_s19, 2048  }
  0x54   : > { %1458 = vsyncadd (%p1879_p6), %s270_s19, 4294965248  ;;  %v1483_v0 = vmov 0.0|0.0   ;;  %vm1484_vm0 = vmmov 0   ;;  %v1485_v1 = vmov 0.0   ;;  %v309_v2 = vld [vmem:[%s1686_s26] sm:$0xff]  ;;  %v310_v3 = vld [vmem:[%s1686_s26 + $0x8] sm:$0xff] }
  0x55   : > { %1187 = vmatprep.subr.bf16.mxu0 %v1483_v0  ;;  %1061 = vmatprep.mubr.msk.f32.mxu0 %vm1484_vm0, %v1485_v1  ;;  %v311_v4 = vld [vmem:[%s1686_s26 + $0x10] sm:$0xff]  ;;  %v1701_v5 = vpack.c.bf16 %v310_v3, %v309_v2  ;;  %v312_v6 = vld [vmem:[%s1686_s26 + $0x18] sm:$0xff]  ;;  %v313_v8 = vld [vmem:[%s1686_s26 + $0x20] sm:$0xff]  ;;  %v1486_v31 = vmov 0   ;;  %vm493_vm1 = vcmask 195584   ;;  %s949_s29 = sshll.u32 %s1544_s25, 7 }
  0x56   : > { %1211 = vmatprep.subr.bf16.mxu1 %v1483_v0  ;;  %1096 = vmatprep.mubr.msk.f32.mxu1 %vm1484_vm0, %v1485_v1  ;;  %v1705_v7 = vpack.c.bf16 %v312_v6, %v311_v4  ;;  %v314_v9 = vld [vmem:[%s1686_s26 + $0x28] sm:$0xff]  ;;  %v315_v11 = vld [vmem:[%s1686_s26 + $0x30] sm:$0xff]  ;;  %v316_v12 = vld [vmem:[%s1686_s26 + $0x38] sm:$0xff]  ;;  %s1819_s8 = scalar_lea.hbm %s1868_s6, %s949_s29  ;;  %s828_s14 = scalar_lea.sflag [#allocation5], %s1672_s12 }
  0x57   : > { %1189 = vmatpush3.bf16.msra.mxu0 %v1701_v5  ;;  %1213 = vmatpush3.bf16.msra.mxu1 %v1701_v5  ;;  %v1713_v10 = vpack.c.bf16 %v314_v9, %v313_v8  ;;  %v1721_v13 = vpack.c.bf16 %v316_v12, %v315_v11  ;;  %v317_v14 = vld [vmem:[%s1686_s26 + $0x40] sm:$0xff]  ;;  %v318_v15 = vld [vmem:[%s1686_s26 + $0x48] sm:$0xff]  ;;  %v319_v17 = vld [vmem:[%s1686_s26 + $0x50] sm:$0xff]  ;;  %p1880_p2 = scmp.ne.s32.totalorder %s1873_s9, 0 }
  0x58   : > { %1190 = vmatprep.subr.bf16.mxu0 %v1483_v0  ;;  %1214 = vmatprep.subr.bf16.mxu1 %v1483_v0  ;;  %v1729_v16 = vpack.c.bf16 %v318_v15, %v317_v14  ;;  %v320_v18 = vld [vmem:[%s1686_s26 + $0x58] sm:$0xff]  ;;  %v321_v20 = vld [vmem:[%s1686_s26 + $0x60] sm:$0xff]  ;;  %v322_v21 = vld [vmem:[%s1686_s26 + $0x68] sm:$0xff] }
  0x59   : > { %v1737_v19 = vpack.c.bf16 %v320_v18, %v319_v17  ;;  %v1745_v22 = vpack.c.bf16 %v322_v21, %v321_v20  ;;  %v323_v23 = vld [vmem:[%s1686_s26 + $0x70] sm:$0xff]  ;;  %v324_v24 = vld [vmem:[%s1686_s26 + $0x78] sm:$0xff]  ;;  %1346 = vset.pattern.permute.xlu0 %v1486_v31 }
  0x5a   : > { %v1209_v25 = vpack.c.bf16 %v324_v24, %v323_v23  ;;  %v307_v26 = vld [vmem:[%s1678_s15] sm:$0xff]  ;;  %s306_s15 = scalar_lea.vmem [#allocation8], %s943_s13  ;;  %s1487_s13 = smov [#allocation8]  }
  0x5b   : > { %1192 = vmatpush3.bf16.msra.mxu0 %v1705_v7  ;;  %1216 = vmatpush3.bf16.msra.mxu1 %v1705_v7  ;;  %v487_v30 = vld [vmem:[%s1865_s3] sm:$0xff]  ;;  %s841_s11 = sshll.u32 %s306_s15, 4  ;;  %s1411_s17 = sshll.u32 %s1487_s13, 4  ;;  %s1821_s11 = int_to_ptr.vmem [resolvable:$true] %s841_s11  ;;  %s1412_s17 = int_to_ptr.vmem [resolvable:$false] %s1411_s17 }
  0x5c   : > { %1193 = vmatprep.subr.bf16.mxu0 %v1483_v0  ;;  %1217 = vmatprep.subr.bf16.mxu1 %v1483_v0  ;;  %v747_v32 = vld [vmem:[%s1867_s5] sm:$0xff]  ;;  %s1407_s25 = scalar_lea.vmem %s1821_s11, 128  ;;  %s1413_s16 = scalar_lea.vmem %s1412_s17, 256 }
  0x5d   : > { %490 = vperm.xlu0 %1346, %v487_v30   ;;  %v483_v33 = vld [vmem:[%s1864_s2] sm:$0xff]  ;;  %p1408_p12 = scmp.ne.s32.totalorder %s1821_s11, %s1407_s25  ;;  %p1414_p7 = scmp.lt.s32.totalorder %s1821_s11, %s1412_s17 }
  0x5e   : > { %v743_v44 = vld [vmem:[%s1866_s4] sm:$0xff]  ;;  %p1415_p8 = scmp.lt.s32.totalorder %s1413_s16, %s1407_s25 }
  0x5f   : > { %1195 = vmatpush3.bf16.msra.mxu0 %v1713_v10  ;;  %1219 = vmatpush3.bf16.msra.mxu1 %v1713_v10  ;;  %p1409_p4 = pnand %p1408_p12, %p1880_p2 }
  0x60   : > { %1196 = vmatprep.subr.bf16.mxu0 %v1483_v0  ;;  %1220 = vmatprep.subr.bf16.mxu1 %v1483_v0  ;;  %p1416_p13 = por %p1415_p8, %p1414_p7 }
  0x61   : > { %750 = vperm.xlu0 %1346, %v747_v32   ;;  %p1410_p9 = pneg %p1409_p4 }
  0x63   : > { %1198 = vmatpush3.bf16.msra.mxu0 %v1721_v13  ;;  %1222 = vmatpush3.bf16.msra.mxu1 %v1721_v13  ;;  %p1417_p0 = pnand %p1416_p13, %p1410_p9 }
  0x64   : > { %1199 = vmatprep.subr.bf16.mxu0 %v1483_v0  ;;  %1223 = vmatprep.subr.bf16.mxu1 %v1483_v0 }
  0x67   : > { %1201 = vmatpush3.bf16.msra.mxu0 %v1729_v16  ;;  %1225 = vmatpush3.bf16.msra.mxu1 %v1729_v16 }
  0x68   : > { %1202 = vmatprep.subr.bf16.mxu0 %v1483_v0  ;;  %1226 = vmatprep.subr.bf16.mxu1 %v1483_v0 }
  0x6b   : > { %1204 = vmatpush3.bf16.msra.mxu0 %v1737_v19  ;;  %1228 = vmatpush3.bf16.msra.mxu1 %v1737_v19 }
  0x6c   : > { %1205 = vmatprep.subr.bf16.mxu0 %v1483_v0  ;;  %1229 = vmatprep.subr.bf16.mxu1 %v1483_v0 }
  0x6f   : > { %1207 = vmatpush3.bf16.msra.mxu0 %v1745_v22  ;;  %1231 = vmatpush3.bf16.msra.mxu1 %v1745_v22 }
  0x70   : > { %1208 = vmatprep.subr.bf16.mxu0 %v1483_v0  ;;  %1232 = vmatprep.subr.bf16.mxu1 %v1483_v0 }
  0x73   : > { %1210 = vmatpush3.bf16.msra.mxu0 %v1209_v25  ;;  %1234 = vmatpush3.bf16.msra.mxu1 %v1209_v25 }
  0x74   : > { %1235 = vmatprep.subr.bf16.mxu0 %v1483_v0  ;;  %1238 = vmatprep.subr.bf16.mxu1 %v1483_v0 }
  0x76   : > { %1062 = vmatmul.mubr.f32.vlgmr.msra.gmra.mrb[0].mxu0 %v307_v26 }
  0x77   : > { %1105 = vmatprep.mubr.msk.f32.mxu0 %vm1484_vm0, %v1485_v1 }
  0xdc   : > { %v491_v36 = vpop.permute.xlu0 %490 }
  0xe0   : > { %v751_v47 = vpop.permute.xlu0 %750 }
 0x149   : > { %v391_v27 = vpop.f32.mrb[0].mxu0 }
 0x14a   : > { %v1236_v28 = vpack.c.bf16 %v391_v27, %v307_v26  ;;  %v1063_v29 = vpop.f32.mrb[1].mxu0  ;;  %1097 = vmatmul.mubr.f32.vlgmr.msra.gmra.mrb[0].mxu1 %v391_v27 }
 0x14b   : > { %1240 = vmatpush3.bf16.msra.mxu1 %v1701_v5  ;;  %1140 = vmatprep.mubr.msk.f32.mxu1 %vm1484_vm0, %v1485_v1 }
 0x14c   : > { %1237 = vmatpush3.bf16.msra.mxu0 %v1236_v28  ;;  %1241 = vmatprep.subr.bf16.mxu1 %v1483_v0 }
 0x14d   : > { %1103 = vmatprep.subr.mxu0 %v1485_v1 }
 0x14f   : > { %1243 = vmatpush3.bf16.msra.mxu1 %v1705_v7 }
 0x150   : > { %1244 = vmatprep.subr.bf16.mxu1 %v1483_v0 }
 0x153   : > { %1246 = vmatpush3.bf16.msra.mxu1 %v1713_v10 }
 0x154   : > { %1247 = vmatprep.subr.bf16.mxu1 %v1483_v0 }
 0x157   : > { %1249 = vmatpush3.bf16.msra.mxu1 %v1721_v13 }
 0x158   : > { %1250 = vmatprep.subr.bf16.mxu1 %v1483_v0 }
 0x15b   : > { %1252 = vmatpush3.bf16.msra.mxu1 %v1729_v16 }
 0x15c   : > { %1253 = vmatprep.subr.bf16.mxu1 %v1483_v0 }
 0x15f   : > { %1255 = vmatpush3.bf16.msra.mxu1 %v1737_v19 }
 0x160   : > { %1256 = vmatprep.subr.bf16.mxu1 %v1483_v0 }
 0x163   : > { %1258 = vmatpush3.bf16.msra.mxu1 %v1745_v22 }
 0x164   : > { %1259 = vmatprep.subr.bf16.mxu1 %v1483_v0 }
 0x167   : > { %1261 = vmatpush3.bf16.msra.mxu1 %v1209_v25 }
 0x168   : > { %1286 = vmatprep.subr.bf16.mxu1 %v1483_v0 }
 0x21d   : > { %v478_v34 = vpop.f32.mrb[0].mxu1 }
 0x21e   : > { %v1098_v35 = vpop.f32.mrb[1].mxu1  ;;  %1104 = vmatpush3.msra.mxu0 %v478_v34 }
 0x21f   : > { %1106 = vmatmul.mubr.msk.f32.vlgmr.msra.gmra.mrb[2].mxu0 %vm493_vm1, %v483_v33  ;;  %1262 = vmatprep.subr.bf16.mxu0 %v1483_v0 }
 0x220   : > { %1264 = vmatpush3.bf16.msra.mxu0 %v1701_v5  ;;  %1175 = vmatprep.mubr.msk.f32.mxu0 %vm1484_vm0, %v1485_v1 }
 0x221   : > { %1265 = vmatprep.subr.bf16.mxu0 %v1483_v0 }
 0x224   : > { %1267 = vmatpush3.bf16.msra.mxu0 %v1705_v7 }
 0x225   : > { %1268 = vmatprep.subr.bf16.mxu0 %v1483_v0 }
 0x228   : > { %1270 = vmatpush3.bf16.msra.mxu0 %v1713_v10 }
 0x229   : > { %1271 = vmatprep.subr.bf16.mxu0 %v1483_v0 }
 0x22c   : > { %1273 = vmatpush3.bf16.msra.mxu0 %v1721_v13 }
 0x22d   : > { %1274 = vmatprep.subr.bf16.mxu0 %v1483_v0 }
 0x230   : > { %1276 = vmatpush3.bf16.msra.mxu0 %v1729_v16 }
 0x231   : > { %1277 = vmatprep.subr.bf16.mxu0 %v1483_v0 }
 0x234   : > { %1279 = vmatpush3.bf16.msra.mxu0 %v1737_v19 }
 0x235   : > { %1280 = vmatprep.subr.bf16.mxu0 %v1483_v0 }
 0x238   : > { %1282 = vmatpush3.bf16.msra.mxu0 %v1745_v22 }
 0x239   : > { %1283 = vmatprep.subr.bf16.mxu0 %v1483_v0 }
 0x23c   : > { %1285 = vmatpush3.bf16.msra.mxu0 %v1209_v25 }
 0x2f2   : > { %v563_v37 = vpop.f32.mrb[2].mxu0 }
 0x2f3   : > { %v564_v38 = vadd.f32 %v563_v37, %v491_v36  ;;  %v1107_v39 = vpop.f32.mrb[3].mxu0 }
 0x2f5   : > { %v567_v40 = vmax.f32 %v564_v38, 0.0 }
 0x2f7   : > { %1141 = vmatmul.mubr.f32.vlgmr.msra.gmra.mrb[2].mxu1 %v567_v40 }
 0x2f8   : > { %1184 = vmatprep.mubr.msk.f32.mxu1 %vm1484_vm0, %v1485_v1 }
 0x3ca   : > { %v651_v41 = vpop.f32.mrb[2].mxu1 }
 0x3cb   : > { %v1287_v42 = vpack.c.bf16 %v651_v41, %v567_v40  ;;  %v1142_v43 = vpop.f32.mrb[3].mxu1  ;;  %1176 = vmatmul.mubr.f32.vlgmr.msra.gmra.mrb[4].mxu0 %v651_v41 }
 0x3cd   : > { %1288 = vmatpush3.bf16.msra.mxu1 %v1287_v42 }
 0x3ce   : > { %1182 = vmatprep.subr.mxu1 %v1485_v1 }
 0x49e   : > { %v738_v45 = vpop.f32.mrb[4].mxu0 }
 0x49f   : > { %v1177_v46 = vpop.f32.mrb[5].mxu0  ;;  %1183 = vmatpush3.msra.mxu1 %v738_v45 }
 0x4a0   : > { %1185 = vmatmul.mubr.msk.f32.vlgmr.msra.gmra.mrb[4].mxu1 %vm493_vm1, %v743_v44 }
 0x573   : > { %v822_v48 = vpop.f32.mrb[4].mxu1 }
 0x574   : > { %v823_v49 = vadd.f32 %v822_v48, %v751_v47  ;;  %v1186_v50 = vpop.f32.mrb[5].mxu1 }
 0x576   : > { %826 = vst [vmem:[%s306_s15] sm:$0xff] %v823_v49 }
 0x577   : > { %1420 = shalt.err (!%p1417_p0)
}
 0x578   : > { %s1421_s12 = scalar_lea.hbm %s1819_s8, 128  ;;  %s1425_s18 = scalar_lea.hbm %s1868_s6, 768 }
 0x579   : > { %p1422_p10 = scmp.ne.s32.totalorder %s1819_s8, %s1421_s12  ;;  %p1426_p3 = scmp.lt.u32.totalorder %s1819_s8, %s1868_s6 }
 0x57a   : > { %p1427_p5 = scmp.lt.u32.totalorder %s1425_s18, %s1421_s12  ;;  %p1429_p12 = scmp.lt.u32.totalorder %s1421_s12, %s1819_s8 }
 0x57b   : > { %p1423_p11 = pnand %p1422_p10, %p1880_p2 }
 0x57c   : > { %p1428_p6 = por %p1427_p5, %p1426_p3 }
 0x57d   : > { %p1424_p1 = pneg %p1423_p11 }
 0x57e   : > { %p1430_p4 = por %p1429_p12, %p1428_p6 }
 0x580   : > { %p1431_p9 = pnand %p1430_p4, %p1424_p1 }
 0x582   : > { %1434 = shalt.err (!%p1431_p9)
}
 0x583   : > { %1293 = dma.vmem_to_hbm [thread:$0]  (%p1880_p2), %s1821_s11, 128, %s1819_s8, %s828_s14  }
 0x584 PF: > { %p1307_p7 = scmp.ge.s32.totalorder %s1477_s24, 2  ;;  %s853_s15 = sand.u32 1, %s1465_s21  }
 0x585   : > { %p1881_p8 = scmp.ne.s32.totalorder %s1874_s10, 0  ;;  %s854_s19 = scalar_lea.sflag [#allocation5], %s853_s15 }
 0x587   : > { %p1303_p13 = pnand %p1307_p7, %p1881_p8 }
 0x589   : > { %1460 = dma.done.wait (!%p1303_p13), %s854_s19, 128  }
 0x58a   : > { %1462 = vsyncadd (!%p1303_p13), %s854_s19, 4294967168  ;;  %p22_p0 = scmp.ge.s32.totalorder %s1548_s27, 8   ;;  %s1882_s21 = smov %s1469_s22 }
 0x58b   : > { %s1883_s22 = smov %s1473_s23  ;;  %s1884_s23 = smov %s1560_s30 }
 0x58c   : > { %s1885_s24 = smov %s1548_s27  ;;  %24 = sbr.rel (!%p22_p0) target bundleno = 7 (0x7), region = 102 }
 0x593   :  { %859 = vsyncpa [#allocation4], 1 }
 0x594   :  { %861 = vsyncpa [#allocation4 + $0x1], 1 }
 0x595   :  { %862 = vsyncpa [#allocation7], 1 }
 0x596   :  { %864 = vsyncpa [#allocation7 + $0x1], 1 }
 0x597   :  { %865 = vsyncpa [#allocation5], 1 }
 0x598   :  { %867 = vsyncpa [#allocation5 + $0x1], 1 }

</bundles_post_ra>
